<compile_context>
chip_gen: v7x
topology: tpu7x:2x2x1
jax: 0.10.0
libtpu: 0.0.40
codegen_flags: <defaults>
</compile_context>

<pallas_src>
import functools

import jax
import jax.numpy as jnp
from jax.experimental import pallas as pl
from jax.experimental.pallas import tpu as pltpu


def _round_up(a, b):
    return ((a + b - 1) // b) * b


def conv2d_bn_kernel(x_ref, xh_ref, w_ref, b_ref, out_ref, xtail_ref, *,
                     offsets, cin, tm, hb, sb):
    # x_ref:     (C, tm)       main flat-input tile (compute dtype)
    # xh_ref:    (C, hb)       cross-tile halo: the next hb flat elements
    # w_ref:     (C_out, K)    gate-folded weights, K = C*KH*KW, tap-major
    # b_ref:     (C_out, 1)    gate-folded bias (f32)
    # out_ref:   (C_out, tm)   lane-dense output tile
    # xtail_ref: (C, sb + hb)  VMEM scratch: last sub-tile window (tail + halo)
    c_out = out_ref.shape[0]
    n_sub = tm // sb
    n_taps = len(offsets)

    # Stitch ONLY the last sub-tile's window (tile tail + halo) into scratch.
    # All other sub-tiles read x_ref directly -> no full-tile staging copy.
    xtail_ref[:, :sb] = x_ref[:, tm - sb:]
    xtail_ref[:, sb:] = xh_ref[...]

    w = w_ref[...]                                        # (C_out, K)
    wks = [w[:, k * cin:(k + 1) * cin] for k in range(n_taps)]  # (C_out, C) per tap
    bias = b_ref[...]                                     # (C_out, 1) f32

    def accumulate(xwin):                                 # xwin: (C, sb + hb)
        acc = jnp.zeros((c_out, sb), jnp.float32)
        for k in range(n_taps):                           # taps innermost, unrolled
            xk = xwin[:, offsets[k]:offsets[k] + sb]      # static lane shift
            acc = acc + jnp.dot(wks[k], xk, preferred_element_type=jnp.float32)
        return acc

    # Sub-tile loop keeps the f32 accumulator small (a few vregs even at tm=8k).
    for s in range(n_sub - 1):
        xwin = x_ref[:, s * sb:s * sb + sb + hb]          # single window load
        out_ref[:, s * sb:(s + 1) * sb] = (accumulate(xwin) + bias).astype(out_ref.dtype)

    # Last sub-tile straddles the tile boundary -> use the stitched window.
    out_ref[:, tm - sb:] = (accumulate(xtail_ref[...]) + bias).astype(out_ref.dtype)


def conv2d_bn_forward(x, weight, bias, bottleneck, *, beta=1.0, padding=1,
                      tm=4096, sb=512, compute_dtype=jnp.bfloat16, out_dtype=None):
    """x: (N, C, H, W); weight: (C_out, C, KH, KW); bias/bottleneck: (C_out,)."""
    if out_dtype is None:
        out_dtype = compute_dtype
    N, C, H, W = x.shape
    C_out, C_in, KH, KW = weight.shape
    assert C == C_in
    Hp, Wp = H + 2 * padding, W + 2 * padding
    Ho, Wo = Hp - KH + 1, Wp - KW + 1
    K = C * KH * KW

    # Tap offsets on the padded grid: output position p reads x_flat[:, p + off].
    offsets = tuple(kh * Wp + kw for kh in range(KH) for kw in range(KW))
    shift_max = offsets[-1]

    # Tile geometry: hb | sb | tm, all lane-aligned (128).
    hb = _round_up(max(shift_max, 1), 128)                # halo width
    sb = _round_up(max(sb, hb), hb)                       # in-kernel sub-tile width
    tm = _round_up(max(tm, sb), sb)                       # grid tile width
    M = N * Hp * Wp                                       # computed over padded grid
    # Keep >= 2 grid steps when possible so both v7x TensorCores get tiles.
    tm = min(tm, max(sb, _round_up(pl.cdiv(M, 2), sb)))
    n_tiles = pl.cdiv(M, tm)
    Mp = n_tiles * tm

    # --- glue: channel-major flattened padded input, cast to compute dtype -------
    # TODO(synk): accept/emit this channel-major flat layout at the module boundary
    # to avoid the wrapper-side pad/transpose/reshape HBM passes entirely.
    xp = jnp.pad(x, ((0, 0), (0, 0), (padding, padding), (padding, padding)))
    x_flat = xp.transpose(1, 0, 2, 3).reshape(C, M).astype(compute_dtype)
    x_flat = jnp.pad(x_flat, ((0, 0), (0, Mp + hb - M)))  # room for last tile's halo

    # --- fold the constant sigmoid gate into W and b (exact) ---------------------
    gate = jax.nn.sigmoid(beta * bottleneck.astype(jnp.float32))            # (C_out,)
    w_flat = weight.transpose(0, 2, 3, 1).reshape(C_out, K).astype(jnp.float32)
    w_folded = (w_flat * gate[:, None]).astype(compute_dtype)               # (C_out, K)
    b_folded = (bias.astype(jnp.float32) * gate).reshape(C_out, 1)          # f32

    kernel = functools.partial(conv2d_bn_kernel, offsets=offsets, cin=C,
                               tm=tm, hb=hb, sb=sb)
    out_flat = pl.pallas_call(
        kernel,
        out_shape=jax.ShapeDtypeStruct((C_out, Mp), out_dtype),
        grid_spec=pltpu.PrefetchScalarGridSpec(
            num_scalar_prefetch=0,
            grid=(n_tiles,),
            in_specs=[
                pl.BlockSpec((C, tm), lambda i: (0, i)),                       # tile
                pl.BlockSpec((C, hb), lambda i: (0, (i + 1) * (tm // hb))),    # halo
                pl.BlockSpec((C_out, K), lambda i: (0, 0)),                    # weights
                pl.BlockSpec((C_out, 1), lambda i: (0, 0)),                    # bias
            ],
            out_specs=pl.BlockSpec((C_out, tm), lambda i: (0, i)),
            scratch_shapes=[pltpu.VMEM((C, sb + hb), compute_dtype)],
        ),
        compiler_params=pltpu.CompilerParams(dimension_semantics=("parallel",)),
    )(x_flat, x_flat, w_folded, b_folded)

    # Valid outputs live at p = n*Hp*Wp + ho*Wp + wo (ho < Ho, wo < Wo); the rest of
    # the padded grid is garbage and is sliced away here.
    out = out_flat[:, :M].reshape(C_out, N, Hp, Wp)[:, :, :Ho, :Wo]
    return out.transpose(1, 0, 2, 3)                      # back to NCHW


if __name__ == "__main__":
    # parent_conv = Conv2d(4, 8, kernel=3, pad=1, bias=True); Conv2dBN(beta=1, init_bn=0.5)
    N, C_in, H, W = 2, 4, 16, 16
    C_out, KH, KW = 8, 3, 3
    beta = 1.0
    init_bn = 0.5

    key = jax.random.PRNGKey(0)
    kx, kw, kb = jax.random.split(key, 3)
    x = jax.random.normal(kx, (N, C_in, H, W), dtype=jnp.float32)
    weight = 0.1 * jax.random.normal(kw, (C_out, C_in, KH, KW), dtype=jnp.float32)
    bias = 0.1 * jax.random.normal(kb, (C_out,), dtype=jnp.float32)
    # Conv2dBN.__init__: bottleneck = init_bn * ones(out_channels)
    bottleneck = init_bn * jnp.ones((C_out,), dtype=jnp.float32)
    # TODO(synk): self.batch_norm is None in __init__ (not modeled); threshold=None branch only.

    # Small tm/sb here so the test exercises multiple grid steps, multiple in-kernel
    # sub-tiles and the stitched cross-tile halo path.  Production: tm=4096-8192,
    # sb=512-1024 (sweep).
    y = conv2d_bn_forward(x, weight, bias, bottleneck, beta=beta, padding=1,
                          tm=512, sb=256)
    y = jax.block_until_ready(y)

    # Pure-JAX f32 reference.
    ref = jax.lax.conv_general_dilated(
        x, weight, window_strides=(1, 1), padding=((1, 1), (1, 1)),
        dimension_numbers=("NCHW", "OIHW", "NCHW"))
    ref = ref + bias.reshape(1, -1, 1, 1)
    ref = ref * jax.nn.sigmoid(beta * bottleneck).reshape(1, -1, 1, 1)

    assert y.shape == (N, C_out, H, W)
    # bf16 inputs/weights/outputs (f32 accumulation) -> loosened tolerance vs f32 ref.
    y32 = y.astype(jnp.float32)
    err = float(jnp.max(jnp.abs(y32 - ref)))
    assert jnp.allclose(y32, ref, atol=5e-2, rtol=5e-2), err
    print("KERNEL_OK")
</pallas_src>

<mosaic_0001>
module attributes {stable_mosaic.version = 11 : i64} {
  func.func @conv2d_bn_kernel(%arg0: i32, %arg1: memref<4x512xbf16, #tpu.memory_space<vmem>>, %arg2: memref<4x128xbf16, #tpu.memory_space<vmem>>, %arg3: memref<8x36xbf16, #tpu.memory_space<vmem>>, %arg4: memref<8x1xf32, #tpu.memory_space<vmem>>, %arg5: memref<8x512xbf16, #tpu.memory_space<vmem>>, %arg6: memref<4x384xbf16, #tpu.memory_space<vmem>>) attributes {dimension_semantics = [#tpu.dimension_semantics<parallel>], iteration_bounds = array<i64: 2>, scalar_prefetch = 0 : i64, scratch_operands = 1 : i64, tpu.core_type = #tpu.core_type<tc>, window_params = [{transform_indices = @transform_0, window_bounds = array<i64: 4, 512>}, {transform_indices = @transform_1, window_bounds = array<i64: 4, 128>}, {pipeline_mode = #tpu.pipeline_mode<synchronous>, transform_indices = @transform_2, window_bounds = array<i64: 8, 36>}, {pipeline_mode = #tpu.pipeline_mode<synchronous>, transform_indices = @transform_3, window_bounds = array<i64: 8, 1>}, {transform_indices = @transform_4, window_bounds = array<i64: 8, 512>}]} {
    %c0 = arith.constant 0 : index
    %c256 = arith.constant 256 : index
    %0 = vector.load %arg1[%c0, %c256] : memref<4x512xbf16, #tpu.memory_space<vmem>>, vector<4x256xbf16>
    %c0_0 = arith.constant 0 : index
    %c0_1 = arith.constant 0 : index
    %1 = vector.load %arg6[%c0_0, %c0_1] : memref<4x384xbf16, #tpu.memory_space<vmem>>, vector<4x256xbf16>
    tpu.vector_store %arg6[%c0_0, %c0_1], %0 {strides = array<i32>} : memref<4x384xbf16, #tpu.memory_space<vmem>>, vector<4x256xbf16>,
    %c0_2 = arith.constant 0 : index
    %c0_3 = arith.constant 0 : index
    %2 = vector.load %arg2[%c0_2, %c0_3] : memref<4x128xbf16, #tpu.memory_space<vmem>>, vector<4x128xbf16>
    %c0_4 = arith.constant 0 : index
    %c256_5 = arith.constant 256 : index
    %3 = vector.load %arg6[%c0_4, %c256_5] : memref<4x384xbf16, #tpu.memory_space<vmem>>, vector<4x128xbf16>
    tpu.vector_store %arg6[%c0_4, %c256_5], %2 {strides = array<i32>} : memref<4x384xbf16, #tpu.memory_space<vmem>>, vector<4x128xbf16>,
    %c0_6 = arith.constant 0 : index
    %c0_7 = arith.constant 0 : index
    %4 = vector.load %arg3[%c0_6, %c0_7] : memref<8x36xbf16, #tpu.memory_space<vmem>>, vector<8x36xbf16>
    %5 = vector.extract_strided_slice %4 {offsets = [0, 0], sizes = [8, 4], strides = [1, 1]} : vector<8x36xbf16> to vector<8x4xbf16>
    %6 = vector.extract_strided_slice %4 {offsets = [0, 4], sizes = [8, 4], strides = [1, 1]} : vector<8x36xbf16> to vector<8x4xbf16>
    %7 = vector.extract_strided_slice %4 {offsets = [0, 8], sizes = [8, 4], strides = [1, 1]} : vector<8x36xbf16> to vector<8x4xbf16>
    %8 = vector.extract_strided_slice %4 {offsets = [0, 12], sizes = [8, 4], strides = [1, 1]} : vector<8x36xbf16> to vector<8x4xbf16>
    %9 = vector.extract_strided_slice %4 {offsets = [0, 16], sizes = [8, 4], strides = [1, 1]} : vector<8x36xbf16> to vector<8x4xbf16>
    %10 = vector.extract_strided_slice %4 {offsets = [0, 20], sizes = [8, 4], strides = [1, 1]} : vector<8x36xbf16> to vector<8x4xbf16>
    %11 = vector.extract_strided_slice %4 {offsets = [0, 24], sizes = [8, 4], strides = [1, 1]} : vector<8x36xbf16> to vector<8x4xbf16>
    %12 = vector.extract_strided_slice %4 {offsets = [0, 28], sizes = [8, 4], strides = [1, 1]} : vector<8x36xbf16> to vector<8x4xbf16>
    %13 = vector.extract_strided_slice %4 {offsets = [0, 32], sizes = [8, 4], strides = [1, 1]} : vector<8x36xbf16> to vector<8x4xbf16>
    %c0_8 = arith.constant 0 : index
    %c0_9 = arith.constant 0 : index
    %14 = vector.load %arg4[%c0_8, %c0_9] : memref<8x1xf32, #tpu.memory_space<vmem>>, vector<8x1xf32>
    %c0_10 = arith.constant 0 : index
    %c0_11 = arith.constant 0 : index
    %15 = vector.load %arg1[%c0_10, %c0_11] : memref<4x512xbf16, #tpu.memory_space<vmem>>, vector<4x384xbf16>
    %cst = arith.constant 0.000000e+00 : f32
    %16 = vector.broadcast %cst : f32 to vector<8x256xf32>
    %17 = vector.extract_strided_slice %15 {offsets = [0, 0], sizes = [4, 256], strides = [1, 1]} : vector<4x384xbf16> to vector<4x256xbf16>
    %cst_12 = arith.constant dense<0.000000e+00> : vector<8x256xf32>
    %18 = tpu.matmul %5, %17, %cst_12 {dimension_numbers = #tpu.dot_dimension_numbers<[1], [0], [0], [1], [0, 0, 1, 1], [], []>} : vector<8x4xbf16>, vector<4x256xbf16>, vector<8x256xf32> -> vector<8x256xf32>
    %19 = arith.addf %16, %18 : vector<8x256xf32>
    %20 = vector.extract_strided_slice %15 {offsets = [0, 1], sizes = [4, 256], strides = [1, 1]} : vector<4x384xbf16> to vector<4x256xbf16>
    %cst_13 = arith.constant dense<0.000000e+00> : vector<8x256xf32>
    %21 = tpu.matmul %6, %20, %cst_13 {dimension_numbers = #tpu.dot_dimension_numbers<[1], [0], [0], [1], [0, 0, 1, 1], [], []>} : vector<8x4xbf16>, vector<4x256xbf16>, vector<8x256xf32> -> vector<8x256xf32>
    %22 = arith.addf %19, %21 : vector<8x256xf32>
    %23 = vector.extract_strided_slice %15 {offsets = [0, 2], sizes = [4, 256], strides = [1, 1]} : vector<4x384xbf16> to vector<4x256xbf16>
    %cst_14 = arith.constant dense<0.000000e+00> : vector<8x256xf32>
    %24 = tpu.matmul %7, %23, %cst_14 {dimension_numbers = #tpu.dot_dimension_numbers<[1], [0], [0], [1], [0, 0, 1, 1], [], []>} : vector<8x4xbf16>, vector<4x256xbf16>, vector<8x256xf32> -> vector<8x256xf32>
    %25 = arith.addf %22, %24 : vector<8x256xf32>
    %26 = vector.extract_strided_slice %15 {offsets = [0, 18], sizes = [4, 256], strides = [1, 1]} : vector<4x384xbf16> to vector<4x256xbf16>
    %cst_15 = arith.constant dense<0.000000e+00> : vector<8x256xf32>
    %27 = tpu.matmul %8, %26, %cst_15 {dimension_numbers = #tpu.dot_dimension_numbers<[1], [0], [0], [1], [0, 0, 1, 1], [], []>} : vector<8x4xbf16>, vector<4x256xbf16>, vector<8x256xf32> -> vector<8x256xf32>
    %28 = arith.addf %25, %27 : vector<8x256xf32>
    %29 = vector.extract_strided_slice %15 {offsets = [0, 19], sizes = [4, 256], strides = [1, 1]} : vector<4x384xbf16> to vector<4x256xbf16>
    %cst_16 = arith.constant dense<0.000000e+00> : vector<8x256xf32>
    %30 = tpu.matmul %9, %29, %cst_16 {dimension_numbers = #tpu.dot_dimension_numbers<[1], [0], [0], [1], [0, 0, 1, 1], [], []>} : vector<8x4xbf16>, vector<4x256xbf16>, vector<8x256xf32> -> vector<8x256xf32>
    %31 = arith.addf %28, %30 : vector<8x256xf32>
    %32 = vector.extract_strided_slice %15 {offsets = [0, 20], sizes = [4, 256], strides = [1, 1]} : vector<4x384xbf16> to vector<4x256xbf16>
    %cst_17 = arith.constant dense<0.000000e+00> : vector<8x256xf32>
    %33 = tpu.matmul %10, %32, %cst_17 {dimension_numbers = #tpu.dot_dimension_numbers<[1], [0], [0], [1], [0, 0, 1, 1], [], []>} : vector<8x4xbf16>, vector<4x256xbf16>, vector<8x256xf32> -> vector<8x256xf32>
    %34 = arith.addf %31, %33 : vector<8x256xf32>
    %35 = vector.extract_strided_slice %15 {offsets = [0, 36], sizes = [4, 256], strides = [1, 1]} : vector<4x384xbf16> to vector<4x256xbf16>
    %cst_18 = arith.constant dense<0.000000e+00> : vector<8x256xf32>
    %36 = tpu.matmul %11, %35, %cst_18 {dimension_numbers = #tpu.dot_dimension_numbers<[1], [0], [0], [1], [0, 0, 1, 1], [], []>} : vector<8x4xbf16>, vector<4x256xbf16>, vector<8x256xf32> -> vector<8x256xf32>
    %37 = arith.addf %34, %36 : vector<8x256xf32>
    %38 = vector.extract_strided_slice %15 {offsets = [0, 37], sizes = [4, 256], strides = [1, 1]} : vector<4x384xbf16> to vector<4x256xbf16>
    %cst_19 = arith.constant dense<0.000000e+00> : vector<8x256xf32>
    %39 = tpu.matmul %12, %38, %cst_19 {dimension_numbers = #tpu.dot_dimension_numbers<[1], [0], [0], [1], [0, 0, 1, 1], [], []>} : vector<8x4xbf16>, vector<4x256xbf16>, vector<8x256xf32> -> vector<8x256xf32>
    %40 = arith.addf %37, %39 : vector<8x256xf32>
    %41 = vector.extract_strided_slice %15 {offsets = [0, 38], sizes = [4, 256], strides = [1, 1]} : vector<4x384xbf16> to vector<4x256xbf16>
    %cst_20 = arith.constant dense<0.000000e+00> : vector<8x256xf32>
    %42 = tpu.matmul %13, %41, %cst_20 {dimension_numbers = #tpu.dot_dimension_numbers<[1], [0], [0], [1], [0, 0, 1, 1], [], []>} : vector<8x4xbf16>, vector<4x256xbf16>, vector<8x256xf32> -> vector<8x256xf32>
    %43 = arith.addf %40, %42 : vector<8x256xf32>
    %44 = vector.broadcast %14 : vector<8x1xf32> to vector<8x256xf32>
    %45 = arith.addf %43, %44 : vector<8x256xf32>
    %46 = arith.truncf %45 : vector<8x256xf32> to vector<8x256xbf16>
    %c0_21 = arith.constant 0 : index
    %c0_22 = arith.constant 0 : index
    %47 = vector.load %arg5[%c0_21, %c0_22] : memref<8x512xbf16, #tpu.memory_space<vmem>>, vector<8x256xbf16>
    tpu.vector_store %arg5[%c0_21, %c0_22], %46 {strides = array<i32>} : memref<8x512xbf16, #tpu.memory_space<vmem>>, vector<8x256xbf16>,
    %c0_23 = arith.constant 0 : index
    %c0_24 = arith.constant 0 : index
    %48 = vector.load %arg6[%c0_23, %c0_24] : memref<4x384xbf16, #tpu.memory_space<vmem>>, vector<4x384xbf16>
    %cst_25 = arith.constant 0.000000e+00 : f32
    %49 = vector.broadcast %cst_25 : f32 to vector<8x256xf32>
    %50 = vector.extract_strided_slice %48 {offsets = [0, 0], sizes = [4, 256], strides = [1, 1]} : vector<4x384xbf16> to vector<4x256xbf16>
    %cst_26 = arith.constant dense<0.000000e+00> : vector<8x256xf32>
    %51 = tpu.matmul %5, %50, %cst_26 {dimension_numbers = #tpu.dot_dimension_numbers<[1], [0], [0], [1], [0, 0, 1, 1], [], []>} : vector<8x4xbf16>, vector<4x256xbf16>, vector<8x256xf32> -> vector<8x256xf32>
    %52 = arith.addf %49, %51 : vector<8x256xf32>
    %53 = vector.extract_strided_slice %48 {offsets = [0, 1], sizes = [4, 256], strides = [1, 1]} : vector<4x384xbf16> to vector<4x256xbf16>
    %cst_27 = arith.constant dense<0.000000e+00> : vector<8x256xf32>
    %54 = tpu.matmul %6, %53, %cst_27 {dimension_numbers = #tpu.dot_dimension_numbers<[1], [0], [0], [1], [0, 0, 1, 1], [], []>} : vector<8x4xbf16>, vector<4x256xbf16>, vector<8x256xf32> -> vector<8x256xf32>
    %55 = arith.addf %52, %54 : vector<8x256xf32>
    %56 = vector.extract_strided_slice %48 {offsets = [0, 2], sizes = [4, 256], strides = [1, 1]} : vector<4x384xbf16> to vector<4x256xbf16>
    %cst_28 = arith.constant dense<0.000000e+00> : vector<8x256xf32>
    %57 = tpu.matmul %7, %56, %cst_28 {dimension_numbers = #tpu.dot_dimension_numbers<[1], [0], [0], [1], [0, 0, 1, 1], [], []>} : vector<8x4xbf16>, vector<4x256xbf16>, vector<8x256xf32> -> vector<8x256xf32>
    %58 = arith.addf %55, %57 : vector<8x256xf32>
    %59 = vector.extract_strided_slice %48 {offsets = [0, 18], sizes = [4, 256], strides = [1, 1]} : vector<4x384xbf16> to vector<4x256xbf16>
    %cst_29 = arith.constant dense<0.000000e+00> : vector<8x256xf32>
    %60 = tpu.matmul %8, %59, %cst_29 {dimension_numbers = #tpu.dot_dimension_numbers<[1], [0], [0], [1], [0, 0, 1, 1], [], []>} : vector<8x4xbf16>, vector<4x256xbf16>, vector<8x256xf32> -> vector<8x256xf32>
    %61 = arith.addf %58, %60 : vector<8x256xf32>
    %62 = vector.extract_strided_slice %48 {offsets = [0, 19], sizes = [4, 256], strides = [1, 1]} : vector<4x384xbf16> to vector<4x256xbf16>
    %cst_30 = arith.constant dense<0.000000e+00> : vector<8x256xf32>
    %63 = tpu.matmul %9, %62, %cst_30 {dimension_numbers = #tpu.dot_dimension_numbers<[1], [0], [0], [1], [0, 0, 1, 1], [], []>} : vector<8x4xbf16>, vector<4x256xbf16>, vector<8x256xf32> -> vector<8x256xf32>
    %64 = arith.addf %61, %63 : vector<8x256xf32>
    %65 = vector.extract_strided_slice %48 {offsets = [0, 20], sizes = [4, 256], strides = [1, 1]} : vector<4x384xbf16> to vector<4x256xbf16>
    %cst_31 = arith.constant dense<0.000000e+00> : vector<8x256xf32>
    %66 = tpu.matmul %10, %65, %cst_31 {dimension_numbers = #tpu.dot_dimension_numbers<[1], [0], [0], [1], [0, 0, 1, 1], [], []>} : vector<8x4xbf16>, vector<4x256xbf16>, vector<8x256xf32> -> vector<8x256xf32>
    %67 = arith.addf %64, %66 : vector<8x256xf32>
    %68 = vector.extract_strided_slice %48 {offsets = [0, 36], sizes = [4, 256], strides = [1, 1]} : vector<4x384xbf16> to vector<4x256xbf16>
    %cst_32 = arith.constant dense<0.000000e+00> : vector<8x256xf32>
    %69 = tpu.matmul %11, %68, %cst_32 {dimension_numbers = #tpu.dot_dimension_numbers<[1], [0], [0], [1], [0, 0, 1, 1], [], []>} : vector<8x4xbf16>, vector<4x256xbf16>, vector<8x256xf32> -> vector<8x256xf32>
    %70 = arith.addf %67, %69 : vector<8x256xf32>
    %71 = vector.extract_strided_slice %48 {offsets = [0, 37], sizes = [4, 256], strides = [1, 1]} : vector<4x384xbf16> to vector<4x256xbf16>
    %cst_33 = arith.constant dense<0.000000e+00> : vector<8x256xf32>
    %72 = tpu.matmul %12, %71, %cst_33 {dimension_numbers = #tpu.dot_dimension_numbers<[1], [0], [0], [1], [0, 0, 1, 1], [], []>} : vector<8x4xbf16>, vector<4x256xbf16>, vector<8x256xf32> -> vector<8x256xf32>
    %73 = arith.addf %70, %72 : vector<8x256xf32>
    %74 = vector.extract_strided_slice %48 {offsets = [0, 38], sizes = [4, 256], strides = [1, 1]} : vector<4x384xbf16> to vector<4x256xbf16>
    %cst_34 = arith.constant dense<0.000000e+00> : vector<8x256xf32>
    %75 = tpu.matmul %13, %74, %cst_34 {dimension_numbers = #tpu.dot_dimension_numbers<[1], [0], [0], [1], [0, 0, 1, 1], [], []>} : vector<8x4xbf16>, vector<4x256xbf16>, vector<8x256xf32> -> vector<8x256xf32>
    %76 = arith.addf %73, %75 : vector<8x256xf32>
    %77 = vector.broadcast %14 : vector<8x1xf32> to vector<8x256xf32>
    %78 = arith.addf %76, %77 : vector<8x256xf32>
    %79 = arith.truncf %78 : vector<8x256xf32> to vector<8x256xbf16>
    %c0_35 = arith.constant 0 : index
    %c256_36 = arith.constant 256 : index
    %80 = vector.load %arg5[%c0_35, %c256_36] : memref<8x512xbf16, #tpu.memory_space<vmem>>, vector<8x256xbf16>
    tpu.vector_store %arg5[%c0_35, %c256_36], %79 {strides = array<i32>} : memref<8x512xbf16, #tpu.memory_space<vmem>>, vector<8x256xbf16>,
    return
  }
  func.func @transform_0(%arg0: i32) -> (i32, i32) {
    %c0_i32 = arith.constant 0 : i32
    %c0_i32_0 = arith.constant 0 : i32
    return %c0_i32, %arg0 : i32, i32
  }
  func.func @transform_1(%arg0: i32) -> (i32, i32) {
    %c1_i32 = arith.constant 1 : i32
    %0 = arith.addi %arg0, %c1_i32 : i32
    %c4_i32 = arith.constant 4 : i32
    %1 = arith.muli %0, %c4_i32 : i32
    %c0_i32 = arith.constant 0 : i32
    %c0_i32_0 = arith.constant 0 : i32
    return %c0_i32, %1 : i32, i32
  }
  func.func @transform_2(%arg0: i32) -> (i32, i32) {
    %c0_i32 = arith.constant 0 : i32
    %c0_i32_0 = arith.constant 0 : i32
    %c0_i32_1 = arith.constant 0 : i32
    return %c0_i32, %c0_i32_0 : i32, i32
  }
  func.func @transform_3(%arg0: i32) -> (i32, i32) {
    %c0_i32 = arith.constant 0 : i32
    %c0_i32_0 = arith.constant 0 : i32
    %c0_i32_1 = arith.constant 0 : i32
    return %c0_i32, %c0_i32_0 : i32, i32
  }
  func.func @transform_4(%arg0: i32) -> (i32, i32) {
    %c0_i32 = arith.constant 0 : i32
    %c0_i32_0 = arith.constant 0 : i32
    return %c0_i32, %arg0 : i32, i32
  }
}

</mosaic_0001>

<bundles_post_ra>
// kernel: tpu_custom_call.1
= control target key start
LH: loop header
LB: loop body
LE: loop exit
PB: predicated region body
PF: predicated region fallthrough
CT: control target
= control target key end

     0   :  { %9 = vsyncpa [#allocation4], 0  ;;  %s2356_s0 = inlined_call_operand.hbm [shape: bf16[4,1152], index: 0, kind: input, shape index: {}]   ;;  %s2357_s1 = inlined_call_operand.hbm [shape: bf16[4,1152], index: 1, kind: input, shape index: {}]   ;;  %s2358_s2 = inlined_call_operand.vmem [shape: bf16[8,36], index: 2, kind: input, shape index: {}]   ;;  %s2359_s3 = inlined_call_operand.vmem [shape: f32[8,1], index: 3, kind: input, shape index: {}]   ;;  %s2360_s4 = inlined_call_operand.hbm [shape: bf16[8,1024], index: 4, kind: output, shape index: {}]  }
   0x1   :  { %11 = vsyncpa [#allocation4 + $0x1], 0 }
   0x2   :  { %12 = vsyncpa [#allocation7], 0 }
   0x3   :  { %14 = vsyncpa [#allocation7 + $0x1], 0 }
   0x4   :  { %15 = vsyncpa [#allocation5], 0 }
   0x5   :  { %17 = vsyncpa [#allocation5 + $0x1], 0  ;;  %s1865_s15 = smov 0   ;;  %s1867_s16 = smov 0  }
   0x6   :  { %s1869_s17 = smov 0   ;;  %s1871_s18 = smov 0  }
   0x7   :  { %s1873_s19 = smov 0   ;;  %s1875_s20 = smov 0  }
   0x8   :  { %s1877_s21 = smov 0  }
   0x9 LB: > { %2367 = sst [smem:[#allocation12_spill]] %s1814_s20  ;;  %s1899_s22 = sadd.s32 4294967295, %s1818_s21   ;;  %s1818_s21 = sphi %s1877_s21, %s2391_s21   ;;  %s1814_s20 = sphi %s1875_s20, %s2390_s20   ;;  %s1810_s19 = sphi %s1873_s19, %s2389_s19   ;;  %s1806_s18 = sphi %s1871_s18, %s2388_s18   ;;  %s1802_s17 = sphi %s1869_s17, %s2387_s17   ;;  %s1798_s16 = sphi %s1867_s16, %s2386_s16   ;;  %s1794_s15 = sphi %s1865_s15, %s2385_s15  }
   0xa   : > { %s1508_s23 = sadd.s32 4294967294, %s1818_s21   ;;  %s1903_s24 = sadd.s32 1, %s1818_s21  }
   0xb   : > { %s30_s25 = sadd.s32 1, %s1814_s20  ;;  %s27_s26 = ssub.s32 %s1818_s21, %s1903_s24 }
   0xc   : > { %p37_p0 = scmp.ne.s32.totalorder %s1814_s20, %s1810_s19  ;;  %p28_p1 = scmp.eq.s32.totalorder %s27_s26, 0 }
   0xd   : > { %p38_p2 = scmp.eq.s32.totalorder %s1818_s21, 0  ;;  %p43_p3 = scmp.ne.s32.totalorder %s1810_s19, %s1806_s18 }
   0xe   : > { %p44_p4 = scmp.eq.s32.totalorder %s1899_s22, 0  ;;  %s1570_s30 = sshll.u32 %s1818_s21, 2 }
   0xf   : > { %s1915_s27 = scalar_select %p28_p1, %s1814_s20, %s30_s25  }
  0x10   : > { %p1922_p5 = por %p38_p2, %p37_p0  ;;  %p1931_p6 = por %p44_p4, %p43_p3 }
  0x11   : > { %2368 = sst [smem:[#allocation13_spill]] %s1915_s27  ;;  %s60_s5 = sadd.s32 1, %s1802_s17 }
  0x12   : > { %s2370_s29 = scalar_select %p1931_p6, 1, 0 }
  0x13   : > { %s1571_s6 = sadd.s32 4, %s1570_s30  ;;  %p67_p7 = scmp.ne.s32.totalorder %s1802_s17, %s1798_s16 }
  0x14   : > { %s1573_s7 = sadd.s32 4, %s1571_s6  ;;  %p73_p8 = scmp.ne.s32.totalorder %s1798_s16, %s1794_s15 }
  0x15   : > { %s57_s8 = ssub.s32 %s1571_s6, %s1573_s7  ;;  %p1942_p9 = por %p67_p7, %p38_p2 }
  0x16   : > { %p58_p10 = scmp.eq.s32.totalorder %s57_s8, 0  ;;  %p1948_p11 = por %p73_p8, %p44_p4 }
  0x17   : > { %s2371_s9 = scalar_select %p1942_p9, 1, 0 }
  0x18   : > { %s2372_s10 = scalar_select %p1948_p11, 1, 0 }
  0x19   : > { %p139_p12 = scmp.eq.s32.totalorder %s1899_s22, 1  ;;  %p145_p13 = scmp.eq.s32.totalorder %s1508_s23, 1 }
  0x1a   : > { %s1954_s11 = scalar_select %p58_p10, %s1802_s17, %s60_s5  }
  0x1b   : > { %p1959_p1 = por %p139_p12, %p37_p0  ;;  %p1966_p2 = por %p145_p13, %p43_p3 }
  0x1c   : > { %2373 = sst [smem:[#allocation14_spill]] %s1954_s11  ;;  %p2362_p4 = scmp.ge.s32.totalorder %s1818_s21, 2 }
  0x1d   : > { %s2374_s12 = scalar_select %p1959_p1, 1, 0 }
  0x1e   : > { %s2375_s13 = scalar_select %p1966_p2, 1, 0 }
  0x1f   : > { %167 = sbr.rel (%p2362_p4) target bundleno = 98 (0x62), region = 24 }
  0x26   : > { %170 = sbr.rel (!%p1922_p5) target bundleno = 72 (0x48), region = 28  ;;  %s171_s14 = sand.u32 (%p1922_p5), 1, %s1814_s20  }
  0x27   : > { %s177_s15 = ssub.s32 (%p1922_p5), 9, %s1570_s30  ;;  %s1513_s23 = sshll.u32 (%p1922_p5), %s171_s14, 3 }
  0x28   : > { %p178_p0 = scmp.lt.s32.totalorder (%p1922_p5), %s177_s15, 4  ;;  %s1979_s5 = scalar_lea.sflag (%p1922_p5), [#allocation4], %s171_s14 }
  0x29   : > { %s175_s6 = scalar_lea.vmem (%p1922_p5), [#allocation3], %s1513_s23 }
  0x2d   : > { %s2393_s15 = smov (!%p178_p0, %s177_s15), 4 }
  0x2e   : > { %s1976_s25 = sshll.u32 %s2393_s15, 5 }
  0x2f   : > { %s182_s26 = ssub.s32 128, %s1976_s25 }
  0x30   : > { %183 = vsyncadd %s1979_s5, %s182_s26  ;;  %p1516_p3 = scmp.ne.s32.totalorder %s1976_s25, 0  ;;  %s1574_s28 = sshll.u32 %s1818_s21, 7 }
  0x31   : > { %s1987_s8 = scalar_lea.hbm %s2356_s0, %s1574_s28  ;;  %s189_s14 = sshll.u32 %s175_s6, 4  ;;  %s190_s14 = int_to_ptr.vmem [resolvable:$true] %s189_s14 }
  0x32   : > { %s1667_s15 = scalar_lea.hbm %s1987_s8, %s1976_s25  ;;  %s1671_s27 = scalar_lea.hbm %s2356_s0, 288 }
  0x33   : > { %p1668_p5 = scmp.ne.s32.totalorder %s1987_s8, %s1667_s15  ;;  %p1672_p10 = scmp.lt.u32.totalorder %s1987_s8, %s2356_s0 }
  0x34   : > { %p1673_p12 = scmp.lt.u32.totalorder %s1671_s27, %s1667_s15  ;;  %p1675_p0 = scmp.lt.u32.totalorder %s1667_s15, %s1987_s8 }
  0x35   : > { %p1669_p7 = pnand %p1668_p5, %p1516_p3 }
  0x36   : > { %p1674_p13 = por %p1673_p12, %p1672_p10 }
  0x37   : > { %p1670_p8 = pneg %p1669_p7 }
  0x38   : > { %p1676_p4 = por %p1675_p0, %p1674_p13 }
  0x3a   : > { %p1677_p2 = pnand %p1676_p4, %p1670_p8 }
  0x3c   : > { %1680 = shalt.err (!%p1677_p2)
}
  0x3d   : > { %s1681_s6 = scalar_lea.vmem %s190_s14, %s1976_s25  ;;  %s1820_s28 = smov [#allocation3]  }
  0x3e   : > { %p1682_p1 = scmp.ne.s32.totalorder %s190_s14, %s1681_s6  ;;  %s1685_s7 = sshll.u32 %s1820_s28, 4  ;;  %s1686_s7 = int_to_ptr.vmem [resolvable:$false] %s1685_s7 }
  0x3f   : > { %s1687_s30 = scalar_lea.vmem %s1686_s7, 256  ;;  %p1688_p11 = scmp.lt.s32.totalorder %s190_s14, %s1686_s7 }
  0x40   : > { %p1683_p5 = pnand %p1682_p1, %p1516_p3  ;;  %p1689_p6 = scmp.lt.s32.totalorder %s1687_s30, %s1681_s6 }
  0x42   : > { %p1684_p7 = pneg %p1683_p5  ;;  %p1690_p9 = por %p1689_p6, %p1688_p11 }
  0x44   : > { %p1691_p10 = pnand %p1690_p9, %p1684_p7 }
  0x46   : > { %1694 = shalt.err (!%p1691_p10)
}
  0x47   : > { %192 = dma.hbm_to_vmem [thread:$0]  (%p1516_p3), %s1987_s8, %s1976_s25, %s190_s14, %s1979_s5  }
  0x48 PF: > { %s196_s20 = sand.u32 1, %s1802_s17   ;;  %s1521_s27 = sshll.u32 %s1818_s21, 7 }
  0x49   : > { %s1520_s11 = sshll.u32 %s196_s20, 1  ;;  %s1450_s26 = scalar_lea.hbm %s2357_s1, %s1521_s27 }
  0x4a   : > { %s2015_s6 = scalar_lea.hbm %s1450_s26, 128  ;;  %s200_s28 = scalar_lea.vmem [#allocation6], %s1520_s11 }
  0x4b   : > { %s209_s7 = sshll.u32 %s200_s28, 4  ;;  %s197_s25 = scalar_lea.sflag [#allocation7], %s196_s20  ;;  %s210_s7 = int_to_ptr.vmem [resolvable:$true] %s209_s7 }
  0x4c   : > { %s1723_s5 = scalar_lea.hbm %s1450_s26, 160  ;;  %p2376_p9 = scmp.ne.s32.totalorder %s2371_s9, 0 }
  0x4d   : > { %p1696_p6 = scmp.ne.s32.totalorder %s2015_s6, %s1723_s5  ;;  %s1699_s30 = scalar_lea.hbm %s2357_s1, 288 }
  0x4e   : > { %p1700_p2 = scmp.lt.u32.totalorder %s2015_s6, %s2357_s1  ;;  %p1701_p4 = scmp.lt.u32.totalorder %s1699_s30, %s1723_s5 }
  0x4f   : > { %p1697_p11 = pnand %p1696_p6, %p2376_p9  ;;  %p1703_p8 = scmp.lt.u32.totalorder %s1723_s5, %s2015_s6 }
  0x50   : > { %p1702_p3 = por %p1701_p4, %p1700_p2 }
  0x51   : > { %p1698_p1 = pneg %p1697_p11 }
  0x52   : > { %p1704_p12 = por %p1703_p8, %p1702_p3 }
  0x54   : > { %p1705_p13 = pnand %p1704_p12, %p1698_p1 }
  0x56   : > { %1708 = shalt.err (!%p1705_p13)
}
  0x57   : > { %s1709_s20 = scalar_lea.vmem %s210_s7, 32  ;;  %s1821_s11 = smov [#allocation6]  }
  0x58   : > { %p1710_p0 = scmp.ne.s32.totalorder %s210_s7, %s1709_s20  ;;  %s1713_s23 = sshll.u32 %s1821_s11, 4  ;;  %s1714_s23 = int_to_ptr.vmem [resolvable:$false] %s1713_s23 }
  0x59   : > { %s1715_s26 = scalar_lea.vmem %s1714_s23, 64  ;;  %p1716_p10 = scmp.lt.s32.totalorder %s210_s7, %s1714_s23 }
  0x5a   : > { %p1711_p5 = pnand %p1710_p0, %p2376_p9  ;;  %p1717_p6 = scmp.lt.s32.totalorder %s1715_s26, %s1709_s20 }
  0x5c   : > { %p1712_p7 = pneg %p1711_p5  ;;  %p1718_p11 = por %p1717_p6, %p1716_p10 }
  0x5e   : > { %p1719_p2 = pnand %p1718_p11, %p1712_p7 }
  0x60   : > { %1722 = shalt.err (!%p1719_p2)
}
  0x61   : > { %1580 = dma.hbm_to_vmem [thread:$0]  (%p2376_p9), %s2015_s6, 32, %s210_s7, %s197_s25  }
  0x62 PF: > { %p1522_p1 = scmp.ge.s32.totalorder %s1818_s21, 1  ;;  %p214_p4 = scmp.lt.s32.totalorder %s1818_s21, 3 }
  0x64   : > { %p215_p3 = pnand %p1522_p1, %p214_p4 }
  0x65   : > { %s2036_s28 = sand.u32 (!%p215_p3), 1, %s1810_s19   ;;  %p2377_p8 = scmp.ne.s32.totalorder (!%p215_p3), %s2370_s29, 0 }
  0x66   : > { %218 = sbr.rel (%p215_p3) target bundleno = 584 (0x248), region = 36  ;;  %s1523_s5 = sshll.u32 (!%p215_p3), %s2036_s28, 3 }
  0x67   : > { %s221_s8 = scalar_lea.sflag (!%p215_p3), [#allocation4], %s2036_s28  ;;  %s224_s14 = scalar_lea.vmem (!%p215_p3), [#allocation3], %s1523_s5 }
  0x6d   : > { %1781 = dma.done.wait (%p2377_p8), %s221_s8, 128  }
  0x6e   : > { %1783 = vsyncadd (%p2377_p8), %s221_s8, 4294967168  ;;  %s229_s9 = sand.u32 1, %s1798_s16   ;;  %p2378_p9 = scmp.ne.s32.totalorder %s2372_s10, 0 }
  0x6f   : > { %s1524_s6 = sshll.u32 %s229_s9, 1  ;;  %s230_s7 = scalar_lea.sflag [#allocation7], %s229_s9 }
  0x70   : > { %s233_s25 = scalar_lea.vmem [#allocation6], %s1524_s6 }
  0x71   : > { %1785 = dma.done.wait (%p2378_p9), %s230_s7, 32  }
  0x72   : > { %1787 = vsyncadd (%p2378_p9), %s230_s7, 4294967264  ;;  %v289_v0 = vlaneseq  ;;  %v1822_v1 = vmov 1983009808   ;;  %vm314_vm0 = vcmask 1041408   ;;  %v272_v6 = vld [vmem:[%s224_s14 + $0x4] sm:$0xf] }
  0x73   : > { %v287_v2 = vunpack.c.l.s4 %v1822_v1  ;;  %v274_v7 = vld [vmem:[%s233_s25] sm:$0x3]  ;;  %v278_v8 = vld [vmem:[%s224_s14] sm:$0x3f]  ;;  %273 = vst [vmem:[#allocation2] sm:$0xf] %v272_v6 }
  0x74   : > { %v290_v3 = vshrl.u32 %v289_v0, 7  ;;  %275 = vst [vmem:[#allocation2 + $0x4] sm:$0x3] %v274_v7  ;;  %v2055_v10 = vld [vmem:[%s2358_s2] sm:$0xf]  ;;  %s1823_s10 = smov 127   ;;  %v285_v15 = vcombine.high %v278_v8, %v278_v8 }
  0x75   : > { %v288_v4 = vunpack.c.0.s8 %v287_v2  ;;  %v2059_v11 = vcombine.low %v2055_v10, %v2055_v10  ;;  %v1824_v14 = vmov 0   ;;  %s1825_s15 = smov 124   ;;  %vm310_vm1 = vcmask 31744   ;;  %s1826_s27 = smov 126   ;;  %v277_v22 = vld [vmem:[%s2359_s3] sm:$0xff] }
  0x76   : > { %353 = vmatprep.mubr.bf16.mxu0 %v1824_v14  ;;  %403 = vmatprep.mubr.bf16.mxu1 %v1824_v14  ;;  %s1827_s20 = smov 110   ;;  %s1828_s11 = smov 120   ;;  %vm307_vm2 = vcmask 1039360   ;;  %vm420_vm3 = vcmask 1031168   ;;  %vm483_vm4 = vcmask 900096   ;;  %vm546_vm5 = vcmask 891904  }
  0x77   : > { %v2049_v5 = vsub.s32 %v288_v4, %v290_v3  ;;  %282 = vrot.lane.b32.xlu1 %v2059_v11, %s1825_s15  ;;  %1663 = vset.pattern.permute.xlu0 %v1824_v14  ;;  %s1829_s23 = smov 116   ;;  %s1830_s26 = smov 109   ;;  %vm609_vm6 = vcmask 883712   ;;  %vm672_vm7 = vcmask 752640   ;;  %vm735_vm8 = vcmask 744448  }
  0x78   : > { %s1831_s5 = smov 108   ;;  %s1832_s8 = smov 112   ;;  %vm798_vm9 = vcmask 736256  }
  0x79   : > { %v292_v9 = vrot.slane %v278_v8, %v2049_v5  ;;  %v299_v16 = vrot.slane %v285_v15, %v2049_v5  ;;  %s1833_s14 = smov 92   ;;  %s1834_s9 = smov 91  }
  0x7a   : > { %s1835_s6 = smov 104   ;;  %s1836_s7 = smov 100  }
  0x7b   : > { %301 = vrot.lane.b32.xlu0 %v292_v9, %s1823_s10  ;;  %v300_v12 = vcombine.high %v292_v9, %v292_v9  ;;  %v366_v13 = vsel %vm314_vm0, %v292_v9, 0  ;;  %477 = vrot.lane.b32.xlu1 %v292_v9, %s1827_s20  ;;  %v869_v17 = vld [vmem:[#allocation2] sm:$0x3f]  ;;  %s1837_s25 = smov 90   ;;  %s1838_s29 = smov 96  }
  0x7c   : > { %v2102_v18 = vrot.slane %v869_v17, %v2049_v5  ;;  %v871_v19 = vcombine.high %v869_v17, %v869_v17  ;;  %s1525_s15 = sshll.u32 %s2036_s28, 4  ;;  %p2379_p13 = scmp.ne.s32.totalorder %s2374_s12, 0 }
  0x7d   : > { %1529 = vmatprep.subr.msk.bf16.mxu1 %vm314_vm0, %v300_v12 }
  0x7e   : > { %372 = vmatpush1.bf16.msra.mxu1 %v366_v13  ;;  %v2107_v20 = vcombine.high %v2102_v18, %v2102_v18  ;;  %v885_v21 = vrot.slane %v871_v19, %v2049_v5 }
  0x7f   : > { %414 = vrot.lane.b32.xlu0 %v292_v9, %s1826_s27  ;;  %305 = vrot.lane.b32.xlu1 %v299_v16, %s1823_s10 }
  0x81   : > { %1530 = vmatmul.mubr.msk.bf16.vlgmr.msra.gmra.mrb[0].mxu1 %vm310_vm1, %v2055_v10 }
  0x82   : > { %527 = vmatprep.mubr.bf16.mxu1 %v1824_v14 }
  0x83   : > { %303 = vrot.lane.b32.xlu0 %v300_v12, %s1823_s10  ;;  %416 = vrot.lane.b32.xlu1 %v300_v12, %s1826_s27 }
  0x87   : > { %418 = vrot.lane.b32.xlu0 %v299_v16, %s1826_s27  ;;  %481 = vrot.lane.b32.xlu1 %v299_v16, %s1827_s20 }
  0x8b   : > { %479 = vrot.lane.b32.xlu0 %v300_v12, %s1827_s20  ;;  %475 = vrot.lane.b32.xlu1 %v2059_v11, %s1829_s23 }
  0x8f   : > { %412 = vrot.lane.b32.xlu0 %v2059_v11, %s1828_s11  ;;  %542 = vrot.lane.b32.xlu1 %v300_v12, %s1830_s26 }
  0x93   : > { %540 = vrot.lane.b32.xlu0 %v292_v9, %s1830_s26  ;;  %603 = vrot.lane.b32.xlu1 %v292_v9, %s1831_s5 }
  0x97   : > { %544 = vrot.lane.b32.xlu0 %v299_v16, %s1830_s26  ;;  %607 = vrot.lane.b32.xlu1 %v299_v16, %s1831_s5 }
  0x9b   : > { %605 = vrot.lane.b32.xlu0 %v300_v12, %s1831_s5  ;;  %601 = vrot.lane.b32.xlu1 %v2059_v11, %s1831_s5 }
  0x9f   : > { %538 = vrot.lane.b32.xlu0 %v2059_v11, %s1832_s8  ;;  %668 = vrot.lane.b32.xlu1 %v300_v12, %s1833_s14  ;;  %s1400_s8 = scalar_lea.sflag [#allocation5], %s2036_s28 }
  0xa3   : > { %666 = vrot.lane.b32.xlu0 %v292_v9, %s1833_s14  ;;  %729 = vrot.lane.b32.xlu1 %v292_v9, %s1834_s9 }
  0xa7   : > { %670 = vrot.lane.b32.xlu0 %v299_v16, %s1833_s14  ;;  %733 = vrot.lane.b32.xlu1 %v299_v16, %s1834_s9 }
  0xab   : > { %731 = vrot.lane.b32.xlu0 %v300_v12, %s1834_s9  ;;  %727 = vrot.lane.b32.xlu1 %v2059_v11, %s1836_s7 }
  0xaf   : > { %664 = vrot.lane.b32.xlu0 %v2059_v11, %s1835_s6  ;;  %794 = vrot.lane.b32.xlu1 %v300_v12, %s1837_s25 }
  0xb3   : > { %792 = vrot.lane.b32.xlu0 %v292_v9, %s1837_s25  ;;  %887 = vrot.lane.b32.xlu1 %v2102_v18, %s1823_s10 }
  0xb7   : > { %796 = vrot.lane.b32.xlu0 %v299_v16, %s1837_s25  ;;  %891 = vrot.lane.b32.xlu1 %v885_v21, %s1823_s10 }
  0xbb   : > { %889 = vrot.lane.b32.xlu0 %v2107_v20, %s1823_s10  ;;  %989 = vrot.lane.b32.xlu1 %v2102_v18, %s1826_s27 }
  0xbf   : > { %790 = vrot.lane.b32.xlu0 %v2059_v11, %s1838_s29  ;;  %993 = vrot.lane.b32.xlu1 %v885_v21, %s1826_s27 }
  0xc3   : > { %991 = vrot.lane.b32.xlu0 %v2107_v20, %s1826_s27  ;;  %1048 = vrot.lane.b32.xlu1 %v2107_v20, %s1827_s20  ;;  %s2292_s27 = scalar_lea.vmem [#allocation8], %s1525_s15 }
  0xc4   : > { %s1414_s11 = sshll.u32 %s2292_s27, 4  ;;  %s2304_s11 = int_to_ptr.vmem [resolvable:$true] %s1414_s11 }
  0xc7   : > { %1046 = vrot.lane.b32.xlu0 %v2102_v18, %s1827_s20  ;;  %1103 = vrot.lane.b32.xlu1 %v2102_v18, %s1830_s26 }
  0xcb   : > { %1050 = vrot.lane.b32.xlu0 %v885_v21, %s1827_s20  ;;  %1107 = vrot.lane.b32.xlu1 %v885_v21, %s1830_s26  ;;  %s1577_s20 = sshll.u32 %s1899_s22, 8  ;;  %s1839_s22 = smov [#allocation8]  }
  0xcf   : > { %1105 = vrot.lane.b32.xlu0 %v2107_v20, %s1830_s26  ;;  %1162 = vrot.lane.b32.xlu1 %v2107_v20, %s1831_s5 }
  0xd3   : > { %1160 = vrot.lane.b32.xlu0 %v2102_v18, %s1831_s5  ;;  %1217 = vrot.lane.b32.xlu1 %v2102_v18, %s1833_s14 }
  0xd7   : > { %1164 = vrot.lane.b32.xlu0 %v885_v21, %s1831_s5  ;;  %1221 = vrot.lane.b32.xlu1 %v885_v21, %s1833_s14  ;;  %s2302_s5 = scalar_lea.hbm %s2360_s4, %s1577_s20 }
  0xdb   : > { %1219 = vrot.lane.b32.xlu0 %v2107_v20, %s1833_s14  ;;  %1276 = vrot.lane.b32.xlu1 %v2107_v20, %s1834_s9  ;;  %s1724_s14 = scalar_lea.vmem %s2304_s11, 256 }
  0xdc   : > { %p1725_p12 = scmp.ne.s32.totalorder %s2304_s11, %s1724_s14 }
  0xde   : > { %p1726_p0 = pnand %p1725_p12, %p2379_p13 }
  0xdf   : > { %1274 = vrot.lane.b32.xlu0 %v2102_v18, %s1834_s9  ;;  %1331 = vrot.lane.b32.xlu1 %v2102_v18, %s1837_s25 }
  0xe0   : > { %p1727_p5 = pneg %p1726_p0 }
  0xe3   : > { %1278 = vrot.lane.b32.xlu0 %v885_v21, %s1834_s9  ;;  %1335 = vrot.lane.b32.xlu1 %v885_v21, %s1837_s25  ;;  %s1728_s9 = sshll.u32 %s1839_s22, 4  ;;  %s1729_s9 = int_to_ptr.vmem [resolvable:$false] %s1728_s9 }
  0xe4   : > { %s1730_s6 = scalar_lea.vmem %s1729_s9, 512  ;;  %p1731_p7 = scmp.lt.s32.totalorder %s2304_s11, %s1729_s9 }
  0xe5   : > { %p1732_p10 = scmp.lt.s32.totalorder %s1730_s6, %s1724_s14 }
  0xe7   : > { %1333 = vrot.lane.b32.xlu0 %v2107_v20, %s1837_s25  ;;  %p1733_p6 = por %p1732_p10, %p1731_p7 }
  0xe9   : > { %v2154_v24 = vpop.permute.xlu1 %282  ;;  %p1734_p11 = pnand %p1733_p6, %p1727_p5 }
  0xeb   : > { %855 = vperm.xlu0 %1663, %v277_v22  }
  0xed   : > { %v302_v23 = vpop.permute.xlu0 %301  ;;  %v478_v26 = vpop.permute.xlu1 %477 }
  0xf1   : > { %v415_v25 = vpop.permute.xlu0 %414  ;;  %v306_v28 = vpop.permute.xlu1 %305 }
  0xf5   : > { %v304_v27 = vpop.permute.xlu0 %303  ;;  %v417_v33 = vpop.permute.xlu1 %416 }
  0xf6   : > { %v308_v29 = vsel %vm307_vm2, %v302_v23, %v304_v27  ;;  %v309_v30 = vsel %vm307_vm2, %v304_v27, %v306_v28  ;;  %v421_v34 = vsel %vm420_vm3, %v415_v25, %v417_v33  ;;  %v943_v25 = vsel %vm314_vm0, %v2102_v18, 0 }
  0xf7   : > { %v316_v31 = vsel %vm314_vm0, %v308_v29, 0  ;;  %1527 = vmatprep.subr.msk.bf16.mxu0 %vm314_vm0, %v309_v30  ;;  %v427_v36 = vsel %vm314_vm0, %v421_v34, 0 }
  0xf8   : > { %322 = vmatpush1.bf16.msra.mxu0 %v316_v31 }
  0xf9   : > { %v419_v32 = vpop.permute.xlu0 %418  ;;  %v482_v39 = vpop.permute.xlu1 %481 }
  0xfa   : > { %v422_v35 = vsel %vm420_vm3, %v417_v33, %v419_v32 }
  0xfb   : > { %1528 = vmatmul.mubr.msk.bf16.vlgmr.msra.gmra.mrb[0].mxu0 %vm310_vm1, %v2154_v24  ;;  %1531 = vmatprep.subr.msk.bf16.mxu0 %vm314_vm0, %v422_v35 }
  0xfc   : > { %433 = vmatpush1.bf16.msra.mxu0 %v427_v36  ;;  %464 = vmatprep.mubr.bf16.mxu0 %v1824_v14 }
  0xfd   : > { %v480_v37 = vpop.permute.xlu0 %479  ;;  %v2173_v43 = vpop.permute.xlu1 %475 }
  0xfe   : > { %v484_v38 = vsel %vm483_vm4, %v478_v26, %v480_v37  ;;  %v485_v41 = vsel %vm483_vm4, %v480_v37, %v482_v39 }
  0xff   : > { %v490_v40 = vsel %vm314_vm0, %v484_v38, 0  ;;  %1533 = vmatprep.subr.msk.bf16.mxu1 %vm314_vm0, %v485_v41 }
 0x100   : > { %496 = vmatpush1.bf16.msra.mxu1 %v490_v40 }
 0x101   : > { %v2171_v42 = vpop.permute.xlu0 %412  ;;  %v543_v45 = vpop.permute.xlu1 %542 }
 0x103   : > { %1532 = vmatmul.mubr.msk.bf16.vlgmr.msra.gmra.mrb[4].mxu0 %vm310_vm1, %v2171_v42  ;;  %1534 = vmatmul.mubr.msk.bf16.vlgmr.msra.gmra.mrb[4].mxu1 %vm310_vm1, %v2173_v43 }
 0x104   : > { %590 = vmatprep.mubr.bf16.mxu0 %v1824_v14  ;;  %653 = vmatprep.mubr.bf16.mxu1 %v1824_v14 }
 0x105   : > { %v541_v44 = vpop.permute.xlu0 %540  ;;  %v604_v49 = vpop.permute.xlu1 %603 }
 0x106   : > { %v547_v46 = vsel %vm546_vm5, %v541_v44, %v543_v45 }
 0x107   : > { %v553_v50 = vsel %vm314_vm0, %v547_v46, 0 }
 0x109   : > { %v545_v47 = vpop.permute.xlu0 %544  ;;  %v608_v53 = vpop.permute.xlu1 %607 }
 0x10a   : > { %v548_v48 = vsel %vm546_vm5, %v543_v45, %v545_v47 }
 0x10b   : > { %1535 = vmatprep.subr.msk.bf16.mxu0 %vm314_vm0, %v548_v48 }
 0x10c   : > { %559 = vmatpush1.bf16.msra.mxu0 %v553_v50 }
 0x10d   : > { %v606_v51 = vpop.permute.xlu0 %605  ;;  %v2191_v57 = vpop.permute.xlu1 %601 }
 0x10e   : > { %v610_v52 = vsel %vm609_vm6, %v604_v49, %v606_v51  ;;  %v611_v55 = vsel %vm609_vm6, %v606_v51, %v608_v53 }
 0x10f   : > { %v616_v54 = vsel %vm314_vm0, %v610_v52, 0  ;;  %1537 = vmatprep.subr.msk.bf16.mxu1 %vm314_vm0, %v611_v55 }
 0x110   : > { %622 = vmatpush1.bf16.msra.mxu1 %v616_v54 }
 0x111   : > { %v2189_v56 = vpop.permute.xlu0 %538  ;;  %v669_v59 = vpop.permute.xlu1 %668 }
 0x112   : > { %1536 = vmatmul.mubr.msk.bf16.vlgmr.msra.gmra.mrb[8].mxu0 %vm310_vm1, %v2189_v56 }
 0x113   : > { %716 = vmatprep.mubr.bf16.mxu0 %v1824_v14  ;;  %1538 = vmatmul.mubr.msk.bf16.vlgmr.msra.gmra.mrb[8].mxu1 %vm310_vm1, %v2191_v57 }
 0x114   : > { %779 = vmatprep.mubr.bf16.mxu1 %v1824_v14 }
 0x115   : > { %v667_v58 = vpop.permute.xlu0 %666  ;;  %v730_v63 = vpop.permute.xlu1 %729 }
 0x116   : > { %v673_v60 = vsel %vm672_vm7, %v667_v58, %v669_v59 }
 0x117   : > { %v679_v0 = vsel %vm314_vm0, %v673_v60, 0 }
 0x119   : > { %v671_v61 = vpop.permute.xlu0 %670  ;;  %v734_v3 = vpop.permute.xlu1 %733 }
 0x11a   : > { %v674_v62 = vsel %vm672_vm7, %v669_v59, %v671_v61 }
 0x11b   : > { %1539 = vmatprep.subr.msk.bf16.mxu0 %vm314_vm0, %v674_v62 }
 0x11c   : > { %685 = vmatpush1.bf16.msra.mxu0 %v679_v0 }
 0x11d   : > { %v732_v1 = vpop.permute.xlu0 %731  ;;  %v2209_v7 = vpop.permute.xlu1 %727 }
 0x11e   : > { %v736_v2 = vsel %vm735_vm8, %v730_v63, %v732_v1  ;;  %v737_v5 = vsel %vm735_vm8, %v732_v1, %v734_v3 }
 0x11f   : > { %v742_v4 = vsel %vm314_vm0, %v736_v2, 0  ;;  %1541 = vmatprep.subr.msk.bf16.mxu1 %vm314_vm0, %v737_v5 }
 0x120   : > { %748 = vmatpush1.bf16.msra.mxu1 %v742_v4 }
 0x121   : > { %v2207_v6 = vpop.permute.xlu0 %664  ;;  %v795_v9 = vpop.permute.xlu1 %794 }
 0x122   : > { %1540 = vmatmul.mubr.msk.bf16.vlgmr.msra.gmra.mrb[12].mxu0 %vm310_vm1, %v2207_v6 }
 0x123   : > { %842 = vmatprep.mubr.bf16.mxu0 %v1824_v14  ;;  %1542 = vmatmul.mubr.msk.bf16.vlgmr.msra.gmra.mrb[12].mxu1 %vm310_vm1, %v2209_v7 }
 0x124   : > { %933 = vmatprep.mubr.bf16.mxu1 %v1824_v14 }
 0x125   : > { %v793_v8 = vpop.permute.xlu0 %792  ;;  %v888_v15 = vpop.permute.xlu1 %887 }
 0x126   : > { %v799_v11 = vsel %vm798_vm9, %v793_v8, %v795_v9 }
 0x127   : > { %v805_v16 = vsel %vm314_vm0, %v799_v11, 0 }
 0x129   : > { %v797_v12 = vpop.permute.xlu0 %796  ;;  %v892_v21 = vpop.permute.xlu1 %891 }
 0x12a   : > { %v800_v13 = vsel %vm798_vm9, %v795_v9, %v797_v12 }
 0x12b   : > { %1543 = vmatprep.subr.msk.bf16.mxu0 %vm314_vm0, %v800_v13 }
 0x12c   : > { %811 = vmatpush1.bf16.msra.mxu0 %v805_v16 }
 0x12d   : > { %v890_v17 = vpop.permute.xlu0 %889  ;;  %1548 = vmatprep.subr.msk.bf16.mxu0 %vm314_vm0, %v2107_v20  ;;  %v990_v27 = vpop.permute.xlu1 %989 }
 0x12e   : > { %v893_v19 = vsel %vm307_vm2, %v888_v15, %v890_v17  ;;  %v894_v23 = vsel %vm307_vm2, %v890_v17, %v892_v21 }
 0x12f   : > { %v896_v22 = vsel %vm314_vm0, %v893_v19, 0  ;;  %1546 = vmatprep.subr.msk.bf16.mxu1 %vm314_vm0, %v894_v23 }
 0x130   : > { %902 = vmatpush1.bf16.msra.mxu1 %v896_v22 }
 0x131   : > { %v2229_v26 = vpop.permute.xlu0 %790  ;;  %v994_v29 = vpop.permute.xlu1 %993 }
 0x132   : > { %1544 = vmatmul.mubr.msk.bf16.vlgmr.msra.gmra.mrb[16].mxu0 %vm310_vm1, %v2229_v26 }
 0x133   : > { %949 = vmatpush1.bf16.msra.mxu0 %v943_v25  ;;  %980 = vmatprep.mubr.bf16.mxu0 %v1824_v14 }
 0x134   : > { %1547 = vmatmul.mubr.msk.bf16.vlgmr.msra.gmra.mrb[16].mxu1 %vm310_vm1, %v2154_v24 }
 0x135   : > { %v992_v20 = vpop.permute.xlu0 %991  ;;  %1035 = vmatprep.mubr.bf16.mxu1 %v1824_v14  ;;  %v1049_v32 = vpop.permute.xlu1 %1048 }
 0x136   : > { %v995_v28 = vsel %vm420_vm3, %v990_v27, %v992_v20  ;;  %v996_v30 = vsel %vm420_vm3, %v992_v20, %v994_v29 }
 0x137   : > { %v998_v18 = vsel %vm314_vm0, %v995_v28, 0  ;;  %1550 = vmatprep.subr.msk.bf16.mxu1 %vm314_vm0, %v996_v30 }
 0x138   : > { %1004 = vmatpush1.bf16.msra.mxu1 %v998_v18 }
 0x139   : > { %v1047_v31 = vpop.permute.xlu0 %1046  ;;  %v1104_v35 = vpop.permute.xlu1 %1103 }
 0x13a   : > { %1549 = vmatmul.mubr.msk.bf16.vlgmr.msra.gmra.mrb[20].mxu0 %vm310_vm1, %v2055_v10  ;;  %v1052_v24 = vsel %vm483_vm4, %v1047_v31, %v1049_v32 }
 0x13b   : > { %1092 = vmatprep.mubr.bf16.mxu0 %v1824_v14  ;;  %v1055_v36 = vsel %vm314_vm0, %v1052_v24, 0 }
 0x13c   : > { %1551 = vmatmul.mubr.msk.bf16.vlgmr.msra.gmra.mrb[20].mxu1 %vm310_vm1, %v2171_v42 }
 0x13d   : > { %v1051_v33 = vpop.permute.xlu0 %1050  ;;  %1149 = vmatprep.mubr.bf16.mxu1 %v1824_v14  ;;  %v1108_v38 = vpop.permute.xlu1 %1107 }
 0x13e   : > { %v1053_v34 = vsel %vm483_vm4, %v1049_v32, %v1051_v33 }
 0x13f   : > { %1552 = vmatprep.subr.msk.bf16.mxu0 %vm314_vm0, %v1053_v34 }
 0x140   : > { %1061 = vmatpush1.bf16.msra.mxu0 %v1055_v36 }
 0x141   : > { %v1106_v37 = vpop.permute.xlu0 %1105  ;;  %v1163_v42 = vpop.permute.xlu1 %1162 }
 0x142   : > { %v1109_v10 = vsel %vm546_vm5, %v1104_v35, %v1106_v37  ;;  %v1110_v40 = vsel %vm546_vm5, %v1106_v37, %v1108_v38 }
 0x143   : > { %v1112_v39 = vsel %vm314_vm0, %v1109_v10, 0  ;;  %1553 = vmatmul.mubr.msk.bf16.vlgmr.msra.gmra.mrb[24].mxu0 %vm310_vm1, %v2173_v43  ;;  %1554 = vmatprep.subr.msk.bf16.mxu1 %vm314_vm0, %v1110_v40 }
 0x144   : > { %1206 = vmatprep.mubr.bf16.mxu0 %v1824_v14  ;;  %1118 = vmatpush1.bf16.msra.mxu1 %v1112_v39 }
 0x145   : > { %v1161_v41 = vpop.permute.xlu0 %1160  ;;  %v1218_v47 = vpop.permute.xlu1 %1217 }
 0x146   : > { %v1166_v44 = vsel %vm609_vm6, %v1161_v41, %v1163_v42 }
 0x147   : > { %1555 = vmatmul.mubr.msk.bf16.vlgmr.msra.gmra.mrb[24].mxu1 %vm310_vm1, %v2189_v56  ;;  %v1169_v43 = vsel %vm314_vm0, %v1166_v44, 0 }
 0x148   : > { %1263 = vmatprep.mubr.bf16.mxu1 %v1824_v14 }
 0x149   : > { %v1165_v45 = vpop.permute.xlu0 %1164  ;;  %v1222_v50 = vpop.permute.xlu1 %1221 }
 0x14a   : > { %v1167_v46 = vsel %vm609_vm6, %v1163_v42, %v1165_v45 }
 0x14b   : > { %1556 = vmatprep.subr.msk.bf16.mxu0 %vm314_vm0, %v1167_v46 }
 0x14c   : > { %1175 = vmatpush1.bf16.msra.mxu0 %v1169_v43 }
 0x14d   : > { %v1220_v48 = vpop.permute.xlu0 %1219  ;;  %v1277_v54 = vpop.permute.xlu1 %1276 }
 0x14e   : > { %v1223_v49 = vsel %vm672_vm7, %v1218_v47, %v1220_v48  ;;  %v1224_v52 = vsel %vm672_vm7, %v1220_v48, %v1222_v50 }
 0x14f   : > { %v1226_v51 = vsel %vm314_vm0, %v1223_v49, 0  ;;  %1557 = vmatmul.mubr.msk.bf16.vlgmr.msra.gmra.mrb[28].mxu0 %vm310_vm1, %v2191_v57  ;;  %1558 = vmatprep.subr.msk.bf16.mxu1 %vm314_vm0, %v1224_v52 }
 0x150   : > { %1320 = vmatprep.mubr.bf16.mxu0 %v1824_v14  ;;  %1232 = vmatpush1.bf16.msra.mxu1 %v1226_v51 }
 0x151   : > { %v1275_v53 = vpop.permute.xlu0 %1274  ;;  %v1332_v57 = vpop.permute.xlu1 %1331 }
 0x152   : > { %v1280_v55 = vsel %vm735_vm8, %v1275_v53, %v1277_v54 }
 0x153   : > { %1559 = vmatmul.mubr.msk.bf16.vlgmr.msra.gmra.mrb[28].mxu1 %vm310_vm1, %v2207_v6  ;;  %v1283_v62 = vsel %vm314_vm0, %v1280_v55, 0 }
 0x154   : > { %v405_v56 = vpop.f32.mrb[0].mxu1  ;;  %1377 = vmatprep.mubr.bf16.mxu1 %v1824_v14 }
 0x155   : > { %v1279_v58 = vpop.permute.xlu0 %1278  ;;  %v407_v59 = vpop.f32.mrb[1].mxu1 }
 0x156   : > { %v1281_v60 = vsel %vm735_vm8, %v1277_v54, %v1279_v58  ;;  %v409_v61 = vpop.f32.mrb[2].mxu1  ;;  %v1336_v2 = vpop.permute.xlu1 %1335 }
 0x157   : > { %1560 = vmatprep.subr.msk.bf16.mxu0 %vm314_vm0, %v1281_v60  ;;  %v410_v63 = vpop.f32.mrb[3].mxu1 }
 0x158   : > { %1289 = vmatpush1.bf16.msra.mxu0 %v1283_v62 }
 0x159   : > { %v1334_v0 = vpop.permute.xlu0 %1333 }
 0x15a   : > { %v1337_v1 = vsel %vm798_vm9, %v1332_v57, %v1334_v0  ;;  %v1338_v4 = vsel %vm798_vm9, %v1334_v0, %v1336_v2 }
 0x15b   : > { %v1340_v3 = vsel %vm314_vm0, %v1337_v1, 0  ;;  %1561 = vmatmul.mubr.msk.bf16.vlgmr.msra.gmra.mrb[32].mxu0 %vm310_vm1, %v2209_v7  ;;  %1562 = vmatprep.subr.msk.bf16.mxu1 %vm314_vm0, %v1338_v4 }
 0x15c   : > { %1346 = vmatpush1.bf16.msra.mxu1 %v1340_v3 }
 0x15f   : > { %1563 = vmatmul.mubr.msk.bf16.vlgmr.msra.gmra.mrb[32].mxu1 %vm310_vm1, %v2229_v26 }
 0x16a   : > { %v2287_v48 = vpop.permute.xlu0 %855 }
 0x1ce   : > { %v355_v14 = vpop.f32.mrb[0].mxu0 }
 0x1cf   : > { %v406_v5 = vadd.f32 %v405_v56, %v355_v14  ;;  %v357_v6 = vpop.f32.mrb[1].mxu0 }
 0x1d0   : > { %v408_v8 = vadd.f32 %v407_v59, %v357_v6  ;;  %v359_v9 = vpop.f32.mrb[2].mxu0 }
 0x1d1   : > { %v360_v11 = vpop.f32.mrb[3].mxu0 }
 0x1d6   : > { %v466_v12 = vpop.f32.mrb[4].mxu0  ;;  %v529_v13 = vpop.f32.mrb[4].mxu1 }
 0x1d7   : > { %v473_v15 = vadd.f32 %v466_v12, %v406_v5  ;;  %v468_v16 = vpop.f32.mrb[5].mxu0  ;;  %v531_v17 = vpop.f32.mrb[5].mxu1 }
 0x1d8   : > { %v474_v19 = vadd.f32 %v468_v16, %v408_v8  ;;  %v470_v21 = vpop.f32.mrb[6].mxu0  ;;  %v533_v7 = vpop.f32.mrb[6].mxu1 }
 0x1d9   : > { %v536_v22 = vadd.f32 %v529_v13, %v473_v15  ;;  %v471_v23 = vpop.f32.mrb[7].mxu0  ;;  %v534_v25 = vpop.f32.mrb[7].mxu1 }
 0x1da   : > { %v537_v27 = vadd.f32 %v531_v17, %v474_v19 }
 0x1e5   : > { %v592_v20 = vpop.f32.mrb[8].mxu0 }
 0x1e6   : > { %v599_v26 = vadd.f32 %v592_v20, %v536_v22  ;;  %v594_v28 = vpop.f32.mrb[9].mxu0  ;;  %v655_v18 = vpop.f32.mrb[8].mxu1 }
 0x1e7   : > { %v600_v29 = vadd.f32 %v594_v28, %v537_v27  ;;  %v596_v30 = vpop.f32.mrb[10].mxu0  ;;  %v657_v32 = vpop.f32.mrb[9].mxu1 }
 0x1e8   : > { %v662_v31 = vadd.f32 %v655_v18, %v599_v26  ;;  %v597_v24 = vpop.f32.mrb[11].mxu0  ;;  %v659_v34 = vpop.f32.mrb[10].mxu1 }
 0x1e9   : > { %v663_v33 = vadd.f32 %v657_v32, %v600_v29  ;;  %v660_v35 = vpop.f32.mrb[11].mxu1 }
 0x1f5   : > { %v718_v36 = vpop.f32.mrb[12].mxu0 }
 0x1f6   : > { %v725_v37 = vadd.f32 %v718_v36, %v662_v31  ;;  %v720_v10 = vpop.f32.mrb[13].mxu0  ;;  %v781_v39 = vpop.f32.mrb[12].mxu1 }
 0x1f7   : > { %v726_v38 = vadd.f32 %v720_v10, %v663_v33  ;;  %v722_v40 = vpop.f32.mrb[14].mxu0  ;;  %v783_v42 = vpop.f32.mrb[13].mxu1 }
 0x1f8   : > { %v788_v41 = vadd.f32 %v781_v39, %v725_v37  ;;  %v723_v44 = vpop.f32.mrb[15].mxu0  ;;  %v785_v46 = vpop.f32.mrb[14].mxu1 }
 0x1f9   : > { %v789_v45 = vadd.f32 %v783_v42, %v726_v38  ;;  %v786_v47 = vpop.f32.mrb[15].mxu1 }
 0x205   : > { %v844_v43 = vpop.f32.mrb[16].mxu0 }
 0x206   : > { %v851_v49 = vadd.f32 %v844_v43, %v788_v41  ;;  %v846_v50 = vpop.f32.mrb[17].mxu0 }
 0x207   : > { %v852_v51 = vadd.f32 %v846_v50, %v789_v45  ;;  %v935_v52 = vpop.f32.mrb[16].mxu1  ;;  %v848_v53 = vpop.f32.mrb[18].mxu0 }
 0x208   : > { %v858_v54 = vadd.f32 %v2287_v48, %v851_v49  ;;  %v937_v55 = vpop.f32.mrb[17].mxu1  ;;  %v849_v56 = vpop.f32.mrb[19].mxu0 }
 0x209   : > { %v859_v58 = vadd.f32 %v2287_v48, %v852_v51  ;;  %v939_v59 = vpop.f32.mrb[18].mxu1 }
 0x20a   : > { %v940_v60 = vpop.f32.mrb[19].mxu1 }
 0x20b   : > { %v1575_v57 = vpack.c.bf16 %v859_v58, %v858_v54 }
 0x20d   : > { %v982_v61 = vpop.f32.mrb[20].mxu0  ;;  %868 = vst [vmem:[%s2292_s27] sm:$0xff] %v1575_v57 }
 0x20e   : > { %v983_v62 = vadd.f32 %v982_v61, %v935_v52  ;;  %v984_v63 = vpop.f32.mrb[21].mxu0 }
 0x20f   : > { %v985_v0 = vadd.f32 %v984_v63, %v937_v55  ;;  %v1037_v1 = vpop.f32.mrb[20].mxu1  ;;  %v986_v2 = vpop.f32.mrb[22].mxu0 }
 0x210   : > { %v1044_v3 = vadd.f32 %v1037_v1, %v983_v62  ;;  %v1039_v4 = vpop.f32.mrb[21].mxu1  ;;  %v987_v14 = vpop.f32.mrb[23].mxu0 }
 0x211   : > { %v1045_v5 = vadd.f32 %v1039_v4, %v985_v0  ;;  %v1041_v6 = vpop.f32.mrb[22].mxu1 }
 0x212   : > { %v1042_v8 = vpop.f32.mrb[23].mxu1 }
 0x216   : > { %v1094_v9 = vpop.f32.mrb[24].mxu0 }
 0x217   : > { %v1101_v11 = vadd.f32 %v1094_v9, %v1044_v3  ;;  %v1096_v12 = vpop.f32.mrb[25].mxu0 }
 0x218   : > { %v1102_v13 = vadd.f32 %v1096_v12, %v1045_v5  ;;  %v1098_v15 = vpop.f32.mrb[26].mxu0 }
 0x219   : > { %v1099_v16 = vpop.f32.mrb[27].mxu0 }
 0x21a   : > { %v1151_v17 = vpop.f32.mrb[24].mxu1 }
 0x21b   : > { %v1158_v19 = vadd.f32 %v1151_v17, %v1101_v11  ;;  %v1153_v21 = vpop.f32.mrb[25].mxu1 }
 0x21c   : > { %v1159_v7 = vadd.f32 %v1153_v21, %v1102_v13  ;;  %v1155_v22 = vpop.f32.mrb[26].mxu1 }
 0x21d   : > { %v1156_v23 = vpop.f32.mrb[27].mxu1 }
 0x222   : > { %v1208_v25 = vpop.f32.mrb[28].mxu0 }
 0x223   : > { %v1215_v27 = vadd.f32 %v1208_v25, %v1158_v19  ;;  %v1210_v20 = vpop.f32.mrb[29].mxu0 }
 0x224   : > { %v1216_v26 = vadd.f32 %v1210_v20, %v1159_v7  ;;  %v1212_v28 = vpop.f32.mrb[30].mxu0 }
 0x225   : > { %v1213_v29 = vpop.f32.mrb[31].mxu0 }
 0x226   : > { %v1265_v18 = vpop.f32.mrb[28].mxu1 }
 0x227   : > { %v1272_v30 = vadd.f32 %v1265_v18, %v1215_v27  ;;  %v1267_v31 = vpop.f32.mrb[29].mxu1 }
 0x228   : > { %v1273_v32 = vadd.f32 %v1267_v31, %v1216_v26  ;;  %v1269_v24 = vpop.f32.mrb[30].mxu1 }
 0x229   : > { %v1270_v33 = vpop.f32.mrb[31].mxu1 }
 0x22e   : > { %v1322_v34 = vpop.f32.mrb[32].mxu0 }
 0x22f   : > { %v1329_v35 = vadd.f32 %v1322_v34, %v1272_v30  ;;  %v1324_v36 = vpop.f32.mrb[33].mxu0 }
 0x230   : > { %v1330_v37 = vadd.f32 %v1324_v36, %v1273_v32  ;;  %v1326_v10 = vpop.f32.mrb[34].mxu0 }
 0x231   : > { %v1327_v38 = vpop.f32.mrb[35].mxu0 }
 0x232   : > { %v1379_v39 = vpop.f32.mrb[32].mxu1 }
 0x233   : > { %v1386_v40 = vadd.f32 %v1379_v39, %v1329_v35  ;;  %v1381_v41 = vpop.f32.mrb[33].mxu1 }
 0x234   : > { %v1387_v42 = vadd.f32 %v1381_v41, %v1330_v37  ;;  %v1383_v44 = vpop.f32.mrb[34].mxu1 }
 0x235   : > { %v1388_v45 = vadd.f32 %v1386_v40, %v2287_v48  ;;  %v1384_v46 = vpop.f32.mrb[35].mxu1 }
 0x236   : > { %v1389_v47 = vadd.f32 %v1387_v42, %v2287_v48 }
 0x238   : > { %v1576_v43 = vpack.c.bf16 %v1389_v47, %v1388_v45 }
 0x23a   : > { %1398 = vst [vmem:[%s2292_s27 + $0x8] sm:$0xff] %v1576_v43 }
 0x23b   : > { %1737 = shalt.err (!%p1734_p11)
}
 0x23c   : > { %s1738_s28 = scalar_lea.hbm %s2302_s5, 256  ;;  %s1742_s29 = scalar_lea.hbm %s2360_s4, 512 }
 0x23d   : > { %p1739_p2 = scmp.ne.s32.totalorder %s2302_s5, %s1738_s28  ;;  %p1743_p3 = scmp.lt.u32.totalorder %s2302_s5, %s2360_s4 }
 0x23e   : > { %p1744_p8 = scmp.lt.u32.totalorder %s1742_s29, %s1738_s28  ;;  %p1746_p12 = scmp.lt.u32.totalorder %s1738_s28, %s2302_s5 }
 0x23f   : > { %p1740_p1 = pnand %p1739_p2, %p2379_p13 }
 0x240   : > { %p1745_p9 = por %p1744_p8, %p1743_p3 }
 0x241   : > { %p1741_p4 = pneg %p1740_p1 }
 0x242   : > { %p1747_p0 = por %p1746_p12, %p1745_p9 }
 0x244   : > { %p1748_p5 = pnand %p1747_p0, %p1741_p4 }
 0x246   : > { %1751 = shalt.err (!%p1748_p5)
}
 0x247   : > { %1583 = dma.vmem_to_hbm [thread:$0]  (%p2379_p13), %s2304_s11, 256, %s2302_s5, %s1400_s8  }
 0x248 PF: > { %s1426_s15 = sand.u32 1, %s1806_s18   ;;  %p2380_p7 = scmp.ne.s32.totalorder %s2375_s13, 0 }
 0x249   : > { %p2381_p10 = scmp.ge.s32.totalorder %s1818_s21, 2  ;;  %s1427_s27 = scalar_lea.sflag [#allocation5], %s1426_s15 }
 0x24b   : > { %p1586_p6 = pnand %p2381_p10, %p2380_p7 }
 0x24d   : > { %1789 = dma.done.wait (!%p1586_p6), %s1427_s27, 256  }
 0x24e   : > { %1791 = vsyncadd (!%p1586_p6), %s1427_s27, 4294967040  ;;  %s2382_s20 = sld [smem:[#allocation14_spill]]  ;;  %s2383_s12 = sld [smem:[#allocation12_spill]] }
 0x24f   : > { %s2384_s23 = sld [smem:[#allocation13_spill]]  ;;  %p20_p13 = scmp.ge.s32.totalorder %s1903_s24, 4  }
 0x250   : > { %s2385_s15 = smov %s1798_s16  ;;  %s2386_s16 = smov %s1802_s17 }
 0x251   : > { %s2388_s18 = smov %s1810_s19  ;;  %s2391_s21 = smov %s1903_s24 }
 0x252   :  { %22 = sbr.rel (!%p20_p13) target bundleno = 9 (0x9), region = 94 }
 0x254   : > { %s2387_s17 = smov %s2382_s20  ;;  %s2389_s19 = smov %s2383_s12 }
 0x255   : > { %s2390_s20 = smov %s2384_s23 }
 0x259   :  { %1432 = vsyncpa [#allocation4], 1 }
 0x25a   :  { %1434 = vsyncpa [#allocation4 + $0x1], 1 }
 0x25b   :  { %1435 = vsyncpa [#allocation7], 1 }
 0x25c   :  { %1437 = vsyncpa [#allocation7 + $0x1], 1 }
 0x25d   :  { %1438 = vsyncpa [#allocation5], 1 }
 0x25e   :  { %1440 = vsyncpa [#allocation5 + $0x1], 1 }

</bundles_post_ra>
